<compile_context>
chip_gen: v6e
topology: v6e:2x2x1
jax: 0.10.0
libtpu: 0.0.40
codegen_flags: <defaults>
</compile_context>

<pallas_src>
import math

import jax
import jax.numpy as jnp
from jax.experimental import pallas as pl
from jax.experimental.pallas import tpu as pltpu

F32 = jnp.float32


def _mlp_kernel(x_ref, w1_ref, b1_ref, w2_ref, b2_ref, o_ref):
    # x_ref: (R, Cin) -- one batch element, R = H*W pixels on sublanes,
    # channels on lanes.  Two MXU matmuls, one EUP tanh, VPU bias adds.
    x = x_ref[...]
    h = jnp.dot(x, w1_ref[...], preferred_element_type=F32) + b1_ref[...]
    h = jnp.tanh(h)
    y = jnp.dot(h, w2_ref[...], preferred_element_type=F32) + b2_ref[...]
    o_ref[...] = y.astype(o_ref.dtype)


@jax.jit
def mlp_forward(x, w1, b1, w2, b2):
    """x: (B, H, W, Cin) NHWC.  Returns (B, H, W, Cout) == torch MLP.forward(x)."""
    B, H, W, Cin = x.shape
    Chid = w1.shape[1]
    Cout = w2.shape[1]
    R = H * W                                    # flatten pixels -> matmul rows
    x3 = x.reshape(B, R, Cin).astype(F32)        # metadata-only reshape outside kernel

    out3 = pl.pallas_call(
        _mlp_kernel,
        out_shape=jax.ShapeDtypeStruct((B, R, Cout), F32),
        grid=(B,),
        in_specs=[
            pl.BlockSpec((pl.Squeezed(), R, Cin), lambda b: (b, 0, 0)),
            pl.BlockSpec((Cin, Chid), lambda b: (0, 0)),   # weights resident each step
            pl.BlockSpec((1, Chid), lambda b: (0, 0)),
            pl.BlockSpec((Chid, Cout), lambda b: (0, 0)),
            pl.BlockSpec((1, Cout), lambda b: (0, 0)),
        ],
        out_specs=pl.BlockSpec((pl.Squeezed(), R, Cout), lambda b: (b, 0, 0)),
        compiler_params=pltpu.CompilerParams(
            dimension_semantics=("parallel",)),  # megacore split over batch on v7x
    )(x3, w1, b1, w2, b2)

    return out3.reshape(B, H, W, Cout)


def init_mlp_params(key, c_in, c_out):
    """Matches PyTorch Conv2d(k=1) default init: U(-1/sqrt(fan_in), 1/sqrt(fan_in)).
    Weights are stored pre-transposed to (Cin, Cout) so the kernel does x @ W."""
    c_hid = c_in // 2
    k1, k2, k3, k4 = jax.random.split(key, 4)
    bd1 = 1.0 / math.sqrt(c_in)
    bd2 = 1.0 / math.sqrt(c_hid)
    w1 = jax.random.uniform(k1, (c_in, c_hid), F32, -bd1, bd1)
    b1 = jax.random.uniform(k2, (1, c_hid), F32, -bd1, bd1)
    w2 = jax.random.uniform(k3, (c_hid, c_out), F32, -bd2, bd2)
    b2 = jax.random.uniform(k4, (1, c_out), F32, -bd2, bd2)
    return w1, b1, w2, b2


if __name__ == "__main__":
    B, H, W, C_IN, C_OUT = 2, 8, 16, 32, 16      # small shapes implied by the module

    key = jax.random.PRNGKey(0)
    kx, kp = jax.random.split(key)
    x = jax.random.normal(kx, (B, H, W, C_IN), F32)
    w1, b1, w2, b2 = init_mlp_params(kp, C_IN, C_OUT)

    out = mlp_forward(x, w1, b1, w2, b2)
    jax.block_until_ready(out)

    # pure-JAX reference: 1x1 conv == channel matmul in NHWC
    ref = jnp.tanh(x @ w1 + b1[0]) @ w2 + b2[0]
    assert out.shape == (B, H, W, C_OUT)
    assert bool(jnp.all(jnp.isfinite(out)))
    assert bool(jnp.allclose(out, ref, rtol=1e-3, atol=1e-3)), \
        float(jnp.max(jnp.abs(out - ref)))
    print("KERNEL_OK")
</pallas_src>

<mosaic_0001>
module attributes {stable_mosaic.version = 11 : i64} {
  func.func @_mlp_kernel(%arg0: i32, %arg1: memref<1x128x32xf32, #tpu.memory_space<vmem>>, %arg2: memref<32x16xf32, #tpu.memory_space<vmem>>, %arg3: memref<1x16xf32, #tpu.memory_space<vmem>>, %arg4: memref<16x16xf32, #tpu.memory_space<vmem>>, %arg5: memref<1x16xf32, #tpu.memory_space<vmem>>, %arg6: memref<1x128x16xf32, #tpu.memory_space<vmem>>) attributes {dimension_semantics = [#tpu.dimension_semantics<parallel>], iteration_bounds = array<i64: 2>, scalar_prefetch = 0 : i64, scratch_operands = 0 : i64, tpu.core_type = #tpu.core_type<tc>, window_params = [{transform_indices = @transform_0, window_bounds = array<i64: 1, 128, 32>}, {pipeline_mode = #tpu.pipeline_mode<synchronous>, transform_indices = @transform_1, window_bounds = array<i64: 32, 16>}, {pipeline_mode = #tpu.pipeline_mode<synchronous>, transform_indices = @transform_2, window_bounds = array<i64: 1, 16>}, {pipeline_mode = #tpu.pipeline_mode<synchronous>, transform_indices = @transform_3, window_bounds = array<i64: 16, 16>}, {pipeline_mode = #tpu.pipeline_mode<synchronous>, transform_indices = @transform_4, window_bounds = array<i64: 1, 16>}, {transform_indices = @transform_5, window_bounds = array<i64: 1, 128, 16>}]} {
    %c0 = arith.constant 0 : index
    %c0_0 = arith.constant 0 : index
    %c0_1 = arith.constant 0 : index
    %0 = vector.load %arg1[%c0, %c0_0, %c0_1] : memref<1x128x32xf32, #tpu.memory_space<vmem>>, vector<1x128x32xf32>
    %1 = vector.shape_cast %0 : vector<1x128x32xf32> to vector<128x32xf32>
    %c0_2 = arith.constant 0 : index
    %c0_3 = arith.constant 0 : index
    %2 = vector.load %arg2[%c0_2, %c0_3] : memref<32x16xf32, #tpu.memory_space<vmem>>, vector<32x16xf32>
    %cst = arith.constant dense<0.000000e+00> : vector<128x16xf32>
    %3 = tpu.matmul %1, %2, %cst {dimension_numbers = #tpu.dot_dimension_numbers<[1], [0], [0], [1], [0, 0, 1, 1], [], []>} : vector<128x32xf32>, vector<32x16xf32>, vector<128x16xf32> -> vector<128x16xf32>
    %c0_4 = arith.constant 0 : index
    %c0_5 = arith.constant 0 : index
    %4 = vector.load %arg3[%c0_4, %c0_5] : memref<1x16xf32, #tpu.memory_space<vmem>>, vector<1x16xf32>
    %5 = vector.broadcast %4 : vector<1x16xf32> to vector<128x16xf32>
    %6 = arith.addf %3, %5 : vector<128x16xf32>
    %7 = math.tanh %6 : vector<128x16xf32>
    %c0_6 = arith.constant 0 : index
    %c0_7 = arith.constant 0 : index
    %8 = vector.load %arg4[%c0_6, %c0_7] : memref<16x16xf32, #tpu.memory_space<vmem>>, vector<16x16xf32>
    %cst_8 = arith.constant dense<0.000000e+00> : vector<128x16xf32>
    %9 = tpu.matmul %7, %8, %cst_8 {dimension_numbers = #tpu.dot_dimension_numbers<[1], [0], [0], [1], [0, 0, 1, 1], [], []>} : vector<128x16xf32>, vector<16x16xf32>, vector<128x16xf32> -> vector<128x16xf32>
    %c0_9 = arith.constant 0 : index
    %c0_10 = arith.constant 0 : index
    %10 = vector.load %arg5[%c0_9, %c0_10] : memref<1x16xf32, #tpu.memory_space<vmem>>, vector<1x16xf32>
    %11 = vector.broadcast %10 : vector<1x16xf32> to vector<128x16xf32>
    %12 = arith.addf %9, %11 : vector<128x16xf32>
    %c0_11 = arith.constant 0 : index
    %c0_12 = arith.constant 0 : index
    %c0_13 = arith.constant 0 : index
    %13 = vector.load %arg6[%c0_11, %c0_12, %c0_13] : memref<1x128x16xf32, #tpu.memory_space<vmem>>, vector<1x128x16xf32>
    %14 = vector.shape_cast %13 : vector<1x128x16xf32> to vector<128x16xf32>
    %15 = vector.shape_cast %12 : vector<128x16xf32> to vector<1x128x16xf32>
    tpu.vector_store %arg6[%c0_11, %c0_12, %c0_13], %15 {strides = array<i32>} : memref<1x128x16xf32, #tpu.memory_space<vmem>>, vector<1x128x16xf32>,
    return
  }
  func.func @transform_0(%arg0: i32) -> (i32, i32, i32) {
    %c0_i32 = arith.constant 0 : i32
    %c0_i32_0 = arith.constant 0 : i32
    %c0_i32_1 = arith.constant 0 : i32
    return %arg0, %c0_i32, %c0_i32_0 : i32, i32, i32
  }
  func.func @transform_1(%arg0: i32) -> (i32, i32) {
    %c0_i32 = arith.constant 0 : i32
    %c0_i32_0 = arith.constant 0 : i32
    %c0_i32_1 = arith.constant 0 : i32
    return %c0_i32, %c0_i32_0 : i32, i32
  }
  func.func @transform_2(%arg0: i32) -> (i32, i32) {
    %c0_i32 = arith.constant 0 : i32
    %c0_i32_0 = arith.constant 0 : i32
    %c0_i32_1 = arith.constant 0 : i32
    return %c0_i32, %c0_i32_0 : i32, i32
  }
  func.func @transform_3(%arg0: i32) -> (i32, i32) {
    %c0_i32 = arith.constant 0 : i32
    %c0_i32_0 = arith.constant 0 : i32
    %c0_i32_1 = arith.constant 0 : i32
    return %c0_i32, %c0_i32_0 : i32, i32
  }
  func.func @transform_4(%arg0: i32) -> (i32, i32) {
    %c0_i32 = arith.constant 0 : i32
    %c0_i32_0 = arith.constant 0 : i32
    %c0_i32_1 = arith.constant 0 : i32
    return %c0_i32, %c0_i32_0 : i32, i32
  }
  func.func @transform_5(%arg0: i32) -> (i32, i32, i32) {
    %c0_i32 = arith.constant 0 : i32
    %c0_i32_0 = arith.constant 0 : i32
    %c0_i32_1 = arith.constant 0 : i32
    return %arg0, %c0_i32, %c0_i32_0 : i32, i32, i32
  }
}

</mosaic_0001>

<bundles_post_ra>
// kernel: mlp_forward.1
= control target key start
LH: loop header
LB: loop body
LE: loop exit
PB: predicated region body
PF: predicated region fallthrough
CT: control target
= control target key end

     0   :  { %10 = vsyncpa [#allocation3], 0  ;;  %s1413_s0 = inlined_call_operand.hbm [shape: f32[2,128,32], index: 0, kind: input, shape index: {}]   ;;  %s1414_s1 = inlined_call_operand.vmem [shape: f32[32,16], index: 1, kind: input, shape index: {}]   ;;  %s1415_s2 = inlined_call_operand.vmem [shape: f32[1,16], index: 2, kind: input, shape index: {}]   ;;  %s1416_s3 = inlined_call_operand.vmem [shape: f32[16,16], index: 3, kind: input, shape index: {}]   ;;  %s1417_s4 = inlined_call_operand.vmem [shape: f32[1,16], index: 4, kind: input, shape index: {}]   ;;  %s1418_s5 = inlined_call_operand.hbm [shape: f32[2,128,16], index: 5, kind: output, shape index: {}]  }
   0x1   :  { %12 = vsyncpa [#allocation3 + $0x1], 0 }
   0x2   :  { %13 = vsyncpa [#allocation4], 0 }
   0x3   :  { %15 = vsyncpa [#allocation4 + $0x1], 0  ;;  %s1146_s18 = smov 0   ;;  %s1148_s19 = smov 0  }
   0x4   :  { %s1150_s20 = smov 0   ;;  %s1152_s21 = smov 0  }
   0x5 LB: > { %s1167_s22 = sadd.s32 4294967295, %s1108_s21   ;;  %s786_s23 = sadd.s32 4294967294, %s1108_s21   ;;  %s1108_s21 = sphi %s1152_s21, %s1433_s21   ;;  %s1104_s20 = sphi %s1150_s20, %s1432_s20   ;;  %s1100_s19 = sphi %s1148_s19, %s1431_s19   ;;  %s1096_s18 = sphi %s1146_s18, %s1430_s18  }
   0x6   : > { %s1171_s24 = sadd.s32 1, %s1108_s21   ;;  %s28_s25 = sadd.s32 1, %s1104_s20 }
   0x7   : > { %s25_s26 = ssub.s32 %s1108_s21, %s1171_s24  ;;  %p35_p0 = scmp.ne.s32.totalorder %s1104_s20, %s1100_s19 }
   0x8   : > { %p26_p1 = scmp.eq.s32.totalorder %s25_s26, 0  ;;  %p36_p2 = scmp.eq.s32.totalorder %s1108_s21, 0 }
   0x9   : > { %p41_p3 = scmp.ne.s32.totalorder %s1100_s19, %s1096_s18  ;;  %p42_p4 = scmp.eq.s32.totalorder %s1167_s22, 0 }
   0xa   : > { %s1183_s27 = scalar_select %p26_p1, %s1104_s20, %s28_s25  }
   0xb   : > { %p1185_p5 = por %p36_p2, %p35_p0  ;;  %p1189_p6 = por %p42_p4, %p41_p3 }
   0xc   : > { %p149_p7 = scmp.eq.s32.totalorder %s1167_s22, 1  ;;  %p155_p8 = scmp.eq.s32.totalorder %s786_s23, 1 }
   0xd   : > { %s1422_s29 = scalar_select %p1189_p6, 1, 0 }
   0xe   : > { %p946_p10 = scmp.lt.s32.totalorder %s1108_s21, 2  ;;  %p1196_p11 = por %p149_p7, %p35_p0 }
   0xf   : > { %p1200_p12 = por %p155_p8, %p41_p3  ;;  %s187_s7 = sand.u32 1, %s1104_s20  }
  0x10   : > { %s1423_s30 = scalar_select %p1196_p11, 1, 0 }
  0x11   : > { %s1424_s6 = scalar_select %p1200_p12, 1, 0 }
  0x12   : > { %s834_s8 = sshll.u32 %s1108_s21, 11  ;;  %s789_s9 = sshll.u32 %s187_s7, 7 }
  0x13   : > { %s1209_s12 = scalar_lea.hbm %s1413_s0, %s834_s8  ;;  %s191_s13 = scalar_lea.vmem [#allocation2], %s789_s9 }
  0x14   : > { %s198_s14 = sshll.u32 %s191_s13, 4  ;;  %p1213_p13 = pnand %p946_p10, %p1185_p5  ;;  %s1217_s14 = int_to_ptr.vmem [resolvable:$true] %s198_s14 }
  0x15   : > { %s1219_s16 = scalar_lea.sflag [#allocation3], %s187_s7  ;;  %s1016_s17 = scalar_lea.hbm %s1209_s12, 2048 }
  0x16   : > { %p1017_p0 = scmp.ne.s32.totalorder %s1209_s12, %s1016_s17  ;;  %p1018_p1 = pneg %p1213_p13 }
  0x17   : > { %s1021_s26 = scalar_lea.hbm %s1413_s0, 4096  ;;  %p1022_p4 = scmp.lt.s32.totalorder %s1209_s12, %s1413_s0 }
  0x18   : > { %p1019_p2 = pnand %p1018_p1, %p1017_p0  ;;  %p1023_p5 = scmp.lt.s32.totalorder %s1021_s26, %s1016_s17 }
  0x1a   : > { %p1020_p3 = pneg %p1019_p2  ;;  %p1024_p7 = por %p1023_p5, %p1022_p4 }
  0x1c   : > { %p1025_p8 = pnand %p1024_p7, %p1020_p3 }
  0x1e   : > { %1028 = shalt.err (!%p1025_p8)
}
  0x1f   : > { %s1029_s7 = scalar_lea.vmem %s1217_s14, 2048  ;;  %s1110_s9 = smov [#allocation2]  }
  0x20   : > { %p1030_p10 = scmp.ne.s32.totalorder %s1217_s14, %s1029_s7  ;;  %s1034_s10 = sshll.u32 %s1110_s9, 4  ;;  %s1035_s10 = int_to_ptr.vmem [resolvable:$false] %s1034_s10 }
  0x21   : > { %s1036_s11 = scalar_lea.vmem %s1035_s10, 4096  ;;  %p1037_p2 = scmp.lt.s32.totalorder %s1217_s14, %s1035_s10 }
  0x22   : > { %p1032_p9 = pnand %p1030_p10, %p1018_p1  ;;  %p1038_p12 = scmp.lt.s32.totalorder %s1036_s11, %s1029_s7 }
  0x24   : > { %p1033_p0 = pneg %p1032_p9  ;;  %p1039_p11 = por %p1038_p12, %p1037_p2 }
  0x26   : > { %p1040_p6 = pnand %p1039_p11, %p1033_p0 }
  0x28   : > { %1043 = shalt.err (!%p1040_p6)
}
  0x29   : > { %s1111_s13 = smov 128   ;;  %s1112_s17 = smov 8  }
  0x2a   : > { %941 = dma.hbm_to_vmem [thread:$0]  (!%p1213_p13), %s1209_s12, 2048, %s1217_s14, %s1219_s16, %s1111_s13, %s1111_s13, %s1112_s17  }
  0x2b   : > { %p792_p9 = scmp.ge.s32.totalorder %s1108_s21, 1  ;;  %p206_p1 = scmp.lt.s32.totalorder %s1108_s21, 3 }
  0x2d   : > { %p207_p3 = pnand %p792_p9, %p206_p1 }
  0x2e   : > { %s1243_s23 = sand.u32 (!%p207_p3), 1, %s1100_s19   ;;  %p1426_p6 = scmp.ne.s32.totalorder (!%p207_p3), %s1422_s29, 0 }
  0x2f   : > { %210 = sbr.rel (%p207_p3) target bundleno = 513 (0x201), region = 40  ;;  %s793_s25 = sshll.u32 (!%p207_p3), %s1243_s23, 7 }
  0x30   : > { %s213_s26 = scalar_lea.sflag (!%p207_p3), [#allocation3], %s1243_s23  ;;  %s1249_s28 = scalar_lea.vmem (!%p207_p3), [#allocation2], %s793_s25 }
  0x34   : > { %1087 = dma.done.wait (%p1426_p6), %s213_s26, 2048  }
  0x35   : > { %1089 = vsyncadd (%p1426_p6), %s213_s26, 4294965248  ;;  %vm270_vm0 = vcmask 261120   ;;  %v262_v0 = vld [vmem:[%s1414_s1 + $0x18] sm:$0xff]  ;;  %v261_v1 = vld [vmem:[%s1414_s1 + $0x10] sm:$0xff]  ;;  %vm489_vm1 = vcmask 130048   ;;  %s1329_s15 = scalar_lea.vmem [#allocation5], %s793_s25 }
  0x36   : > { %874 = vmatprep.subr.mxu0 %v262_v0  ;;  %v243_v2 = vld [vmem:[%s1249_s28] sm:$0xff]  ;;  %v260_v3 = vld [vmem:[%s1414_s1 + $0x8] sm:$0xff]  ;;  %v245_v6 = vld [vmem:[%s1249_s28 + $0x10] sm:$0xff]  ;;  %s835_s25 = sshll.u32 %s1167_s22, 11  ;;  %s713_s16 = sshll.u32 %s1329_s15, 4  ;;  %s1366_s16 = int_to_ptr.vmem [resolvable:$true] %s713_s16 }
  0x37   : > { %875 = vmatpush3.msra.mxu0 %v262_v0  ;;  %882 = vmatprep.mubr.msk.f32.mxu0 %vm270_vm0, %v243_v2  ;;  %v259_v4 = vld [vmem:[%s1414_s1] sm:$0xff]  ;;  %v244_v5 = vld [vmem:[%s1249_s28 + $0x8] sm:$0xff]  ;;  %v246_v7 = vld [vmem:[%s1249_s28 + $0x18] sm:$0xff]  ;;  %s1364_s7 = scalar_lea.hbm %s1418_s5, %s835_s25  ;;  %s700_s22 = scalar_lea.sflag [#allocation4], %s1243_s23 }
  0x38   : > { %876 = vmatprep.subr.mxu0 %v261_v1  ;;  %v247_v8 = vld [vmem:[%s1249_s28 + $0x20] sm:$0xff]  ;;  %v248_v9 = vld [vmem:[%s1249_s28 + $0x28] sm:$0xff]  ;;  %v249_v10 = vld [vmem:[%s1249_s28 + $0x30] sm:$0xff]  ;;  %s1044_s9 = scalar_lea.vmem %s1366_s16, 2048  ;;  %p1427_p12 = scmp.ne.s32.totalorder %s1423_s30, 0 }
  0x39   : > { %877 = vmatpush3.msra.mxu0 %v261_v1  ;;  %v250_v11 = vld [vmem:[%s1249_s28 + $0x38] sm:$0xff]  ;;  %v251_v12 = vld [vmem:[%s1249_s28 + $0x40] sm:$0xff]  ;;  %v252_v13 = vld [vmem:[%s1249_s28 + $0x48] sm:$0xff]  ;;  %p1045_p11 = scmp.ne.s32.totalorder %s1366_s16, %s1044_s9  ;;  %s1113_s10 = smov [#allocation5]  }
  0x3a   : > { %878 = vmatprep.subr.mxu0 %v260_v3  ;;  %v253_v14 = vld [vmem:[%s1249_s28 + $0x50] sm:$0xff]  ;;  %v254_v15 = vld [vmem:[%s1249_s28 + $0x58] sm:$0xff]  ;;  %v255_v16 = vld [vmem:[%s1249_s28 + $0x60] sm:$0xff]  ;;  %s1048_s11 = sshll.u32 %s1113_s10, 4  ;;  %s1049_s11 = int_to_ptr.vmem [resolvable:$false] %s1048_s11 }
  0x3b   : > { %879 = vmatpush3.msra.mxu0 %v260_v3  ;;  %v256_v17 = vld [vmem:[%s1249_s28 + $0x68] sm:$0xff]  ;;  %v257_v18 = vld [vmem:[%s1249_s28 + $0x70] sm:$0xff]  ;;  %v258_v19 = vld [vmem:[%s1249_s28 + $0x78] sm:$0xff]  ;;  %p1046_p13 = pnand %p1045_p11, %p1427_p12  ;;  %s1050_s13 = scalar_lea.vmem %s1049_s11, 4096 }
  0x3c   : > { %880 = vmatprep.subr.mxu0 %v259_v4  ;;  %v481_v20 = vld [vmem:[%s1416_s3 + $0x8] sm:$0xff]  ;;  %v480_v21 = vld [vmem:[%s1416_s3] sm:$0xff]  ;;  %p1051_p5 = scmp.lt.s32.totalorder %s1366_s16, %s1049_s11  ;;  %p1052_p7 = scmp.lt.s32.totalorder %s1050_s13, %s1044_s9 }
  0x3d   : > { %881 = vmatpush3.msra.mxu0 %v259_v4  ;;  %906 = vmatprep.subr.mxu1 %v481_v20  ;;  %v795_v22 = vld [vmem:[%s1415_s2] ss:$0 sm:$0xff]  ;;  %p1047_p4 = pneg %p1046_p13 }
  0x3e   : > { %883 = vmatmul.mubr.msk.f32.vlgmr.msra.gmra.mxu0 %vm270_vm0, %v244_v5  ;;  %907 = vmatpush3.msra.mxu1 %v481_v20  ;;  %p1053_p8 = por %p1052_p7, %p1051_p5 }
  0x3f   : > { %885 = vmatprep.mubr.msk.f32.mxu0 %vm270_vm0, %v245_v6  ;;  %908 = vmatprep.subr.mxu1 %v480_v21 }
  0x40   : > { %909 = vmatpush3.msra.mxu1 %v480_v21  ;;  %p1054_p10 = pnand %p1053_p8, %p1047_p4 }
  0x42   : > { %886 = vmatmul.mubr.msk.f32.gmra.mxu0 %vm270_vm0, %v246_v7  ;;  %v812_v7 = vld [vmem:[%s1417_s4] ss:$0 sm:$0xff] }
  0x43   : > { %888 = vmatprep.mubr.msk.f32.mxu0 %vm270_vm0, %v247_v8 }
  0x46   : > { %889 = vmatmul.mubr.msk.f32.gmra.mxu0 %vm270_vm0, %v248_v9 }
  0x47   : > { %891 = vmatprep.mubr.msk.f32.mxu0 %vm270_vm0, %v249_v10 }
  0x4a   : > { %892 = vmatmul.mubr.msk.f32.gmra.mxu0 %vm270_vm0, %v250_v11 }
  0x4b   : > { %894 = vmatprep.mubr.msk.f32.mxu0 %vm270_vm0, %v251_v12 }
  0x4e   : > { %895 = vmatmul.mubr.msk.f32.gmra.mxu0 %vm270_vm0, %v252_v13 }
  0x4f   : > { %897 = vmatprep.mubr.msk.f32.mxu0 %vm270_vm0, %v253_v14 }
  0x52   : > { %898 = vmatmul.mubr.msk.f32.gmra.mxu0 %vm270_vm0, %v254_v15 }
  0x53   : > { %900 = vmatprep.mubr.msk.f32.mxu0 %vm270_vm0, %v255_v16 }
  0x56   : > { %901 = vmatmul.mubr.msk.f32.gmra.mxu0 %vm270_vm0, %v256_v17 }
  0x57   : > { %903 = vmatprep.mubr.msk.f32.mxu0 %vm270_vm0, %v257_v18 }
  0x5a   : > { %904 = vmatmul.mubr.msk.f32.gmra.mxu0 %vm270_vm0, %v258_v19 }
  0xfe   : > { %v884_v23 = vpop.f32.mrf.mxu0 }
  0xff   : > { %v391_v24 = vadd.f32 %v884_v23, %v795_v22 }
 0x100   : > { %v385_v25 = vpop.f32.mrf.mxu0 }
 0x101   : > { %v386_v26 = vadd.f32 %v795_v22, %v385_v25 }
 0x102   : > { %v887_v27 = vpop.f32.mrf.mxu0 }
 0x103   : > { %984 = vtanh.f32 %v386_v26  ;;  %v401_v28 = vadd.f32 %v887_v27, %v795_v22 }
 0x104   : > { %986 = vtanh.f32 %v391_v24  ;;  %v395_v29 = vpop.f32.mrf.mxu0 }
 0x105   : > { %v396_v30 = vadd.f32 %v795_v22, %v395_v29 }
 0x106   : > { %v890_v31 = vpop.f32.mrf.mxu0 }
 0x107   : > { %988 = vtanh.f32 %v396_v30  ;;  %v411_v32 = vadd.f32 %v890_v31, %v795_v22 }
 0x108   : > { %990 = vtanh.f32 %v401_v28  ;;  %v405_v33 = vpop.f32.mrf.mxu0 }
 0x109   : > { %v406_v34 = vadd.f32 %v795_v22, %v405_v33 }
 0x10a   : > { %v893_v35 = vpop.f32.mrf.mxu0 }
 0x10b   : > { %992 = vtanh.f32 %v406_v34  ;;  %v421_v36 = vadd.f32 %v893_v35, %v795_v22 }
 0x10c   : > { %994 = vtanh.f32 %v411_v32  ;;  %v415_v37 = vpop.f32.mrf.mxu0 }
 0x10d   : > { %v416_v38 = vadd.f32 %v795_v22, %v415_v37 }
 0x10e   : > { %v896_v39 = vpop.f32.mrf.mxu0 }
 0x10f   : > { %996 = vtanh.f32 %v416_v38  ;;  %v431_v41 = vadd.f32 %v896_v39, %v795_v22 }
 0x110   : > { %v985_v40 = vpop.eup %984  ;;  %998 = vtanh.f32 %v421_v36  ;;  %v425_v42 = vpop.f32.mrf.mxu0 }
 0x111   : > { %v987_v43 = vpop.eup %986  ;;  %v426_v44 = vadd.f32 %v795_v22, %v425_v42  ;;  %910 = vmatprep.mubr.msk.f32.mxu1 %vm489_vm1, %v985_v40 }
 0x112   : > { %v899_v45 = vpop.f32.mrf.mxu0  ;;  %911 = vmatmul.mubr.msk.f32.vlgmr.msra.gmra.mxu1 %vm489_vm1, %v987_v43 }
 0x113   : > { %1000 = vtanh.f32 %v426_v44  ;;  %v441_v47 = vadd.f32 %v899_v45, %v795_v22 }
 0x114   : > { %v989_v46 = vpop.eup %988  ;;  %1002 = vtanh.f32 %v431_v41  ;;  %v435_v48 = vpop.f32.mrf.mxu0 }
 0x115   : > { %v991_v49 = vpop.eup %990  ;;  %v436_v50 = vadd.f32 %v795_v22, %v435_v48  ;;  %913 = vmatprep.mubr.msk.f32.mxu1 %vm489_vm1, %v989_v46 }
 0x116   : > { %v902_v51 = vpop.f32.mrf.mxu0  ;;  %914 = vmatmul.mubr.msk.f32.gmra.mxu1 %vm489_vm1, %v991_v49 }
 0x117   : > { %1004 = vtanh.f32 %v436_v50  ;;  %v451_v53 = vadd.f32 %v902_v51, %v795_v22 }
 0x118   : > { %v993_v52 = vpop.eup %992  ;;  %1006 = vtanh.f32 %v441_v47  ;;  %v445_v54 = vpop.f32.mrf.mxu0 }
 0x119   : > { %v995_v55 = vpop.eup %994  ;;  %v446_v56 = vadd.f32 %v795_v22, %v445_v54  ;;  %916 = vmatprep.mubr.msk.f32.mxu1 %vm489_vm1, %v993_v52 }
 0x11a   : > { %v905_v57 = vpop.f32.mrf.mxu0  ;;  %917 = vmatmul.mubr.msk.f32.gmra.mxu1 %vm489_vm1, %v995_v55 }
 0x11b   : > { %1008 = vtanh.f32 %v446_v56  ;;  %v461_v59 = vadd.f32 %v905_v57, %v795_v22 }
 0x11c   : > { %v997_v58 = vpop.eup %996  ;;  %1010 = vtanh.f32 %v451_v53  ;;  %v455_v60 = vpop.f32.mrf.mxu0 }
 0x11d   : > { %v999_v61 = vpop.eup %998  ;;  %v456_v62 = vadd.f32 %v795_v22, %v455_v60  ;;  %919 = vmatprep.mubr.msk.f32.mxu1 %vm489_vm1, %v997_v58 }
 0x11e   : > { %920 = vmatmul.mubr.msk.f32.gmra.mxu1 %vm489_vm1, %v999_v61 }
 0x11f   : > { %1012 = vtanh.f32 %v456_v62 }
 0x120   : > { %v1001_v63 = vpop.eup %1000  ;;  %1014 = vtanh.f32 %v461_v59 }
 0x121   : > { %v1003_v0 = vpop.eup %1002  ;;  %922 = vmatprep.mubr.msk.f32.mxu1 %vm489_vm1, %v1001_v63 }
 0x122   : > { %923 = vmatmul.mubr.msk.f32.gmra.mxu1 %vm489_vm1, %v1003_v0 }
 0x124   : > { %v1005_v1 = vpop.eup %1004 }
 0x125   : > { %v1007_v2 = vpop.eup %1006  ;;  %925 = vmatprep.mubr.msk.f32.mxu1 %vm489_vm1, %v1005_v1 }
 0x126   : > { %926 = vmatmul.mubr.msk.f32.gmra.mxu1 %vm489_vm1, %v1007_v2 }
 0x128   : > { %v1009_v3 = vpop.eup %1008 }
 0x129   : > { %v1011_v4 = vpop.eup %1010  ;;  %928 = vmatprep.mubr.msk.f32.mxu1 %vm489_vm1, %v1009_v3 }
 0x12a   : > { %929 = vmatmul.mubr.msk.f32.gmra.mxu1 %vm489_vm1, %v1011_v4 }
 0x12c   : > { %v1013_v5 = vpop.eup %1012 }
 0x12d   : > { %v1015_v6 = vpop.eup %1014  ;;  %931 = vmatprep.mubr.msk.f32.mxu1 %vm489_vm1, %v1013_v5 }
 0x12e   : > { %932 = vmatmul.mubr.msk.f32.gmra.mxu1 %vm489_vm1, %v1015_v6 }
 0x1d2   : > { %v912_v8 = vpop.f32.mrf.mxu1 }
 0x1d3   : > { %v610_v9 = vadd.f32 %v912_v8, %v812_v7 }
 0x1d4   : > { %v604_v10 = vpop.f32.mrf.mxu1 }
 0x1d5   : > { %684 = vst.msk [vmem:[%s1329_s15 + $0x8] sm:$0xff] %vm489_vm1, %v610_v9  ;;  %v605_v11 = vadd.f32 %v812_v7, %v604_v10 }
 0x1d6   : > { %v915_v12 = vpop.f32.mrf.mxu1 }
 0x1d7   : > { %683 = vst.msk [vmem:[%s1329_s15] sm:$0xff] %vm489_vm1, %v605_v11  ;;  %v620_v13 = vadd.f32 %v915_v12, %v812_v7 }
 0x1d8   : > { %v614_v14 = vpop.f32.mrf.mxu1 }
 0x1d9   : > { %686 = vst.msk [vmem:[%s1329_s15 + $0x18] sm:$0xff] %vm489_vm1, %v620_v13  ;;  %v615_v15 = vadd.f32 %v812_v7, %v614_v14 }
 0x1da   : > { %v918_v16 = vpop.f32.mrf.mxu1 }
 0x1db   : > { %685 = vst.msk [vmem:[%s1329_s15 + $0x10] sm:$0xff] %vm489_vm1, %v615_v15  ;;  %v630_v17 = vadd.f32 %v918_v16, %v812_v7 }
 0x1dc   : > { %v624_v18 = vpop.f32.mrf.mxu1 }
 0x1dd   : > { %688 = vst.msk [vmem:[%s1329_s15 + $0x28] sm:$0xff] %vm489_vm1, %v630_v17  ;;  %v625_v19 = vadd.f32 %v812_v7, %v624_v18 }
 0x1de   : > { %v921_v20 = vpop.f32.mrf.mxu1 }
 0x1df   : > { %687 = vst.msk [vmem:[%s1329_s15 + $0x20] sm:$0xff] %vm489_vm1, %v625_v19  ;;  %v640_v21 = vadd.f32 %v921_v20, %v812_v7 }
 0x1e0   : > { %v634_v22 = vpop.f32.mrf.mxu1 }
 0x1e1   : > { %690 = vst.msk [vmem:[%s1329_s15 + $0x38] sm:$0xff] %vm489_vm1, %v640_v21  ;;  %v635_v23 = vadd.f32 %v812_v7, %v634_v22 }
 0x1e2   : > { %v924_v24 = vpop.f32.mrf.mxu1 }
 0x1e3   : > { %689 = vst.msk [vmem:[%s1329_s15 + $0x30] sm:$0xff] %vm489_vm1, %v635_v23  ;;  %v650_v25 = vadd.f32 %v924_v24, %v812_v7 }
 0x1e4   : > { %v644_v26 = vpop.f32.mrf.mxu1 }
 0x1e5   : > { %692 = vst.msk [vmem:[%s1329_s15 + $0x48] sm:$0xff] %vm489_vm1, %v650_v25  ;;  %v645_v27 = vadd.f32 %v812_v7, %v644_v26 }
 0x1e6   : > { %v927_v28 = vpop.f32.mrf.mxu1 }
 0x1e7   : > { %691 = vst.msk [vmem:[%s1329_s15 + $0x40] sm:$0xff] %vm489_vm1, %v645_v27  ;;  %v660_v29 = vadd.f32 %v927_v28, %v812_v7 }
 0x1e8   : > { %v654_v30 = vpop.f32.mrf.mxu1 }
 0x1e9   : > { %694 = vst.msk [vmem:[%s1329_s15 + $0x58] sm:$0xff] %vm489_vm1, %v660_v29  ;;  %v655_v31 = vadd.f32 %v812_v7, %v654_v30 }
 0x1ea   : > { %v930_v32 = vpop.f32.mrf.mxu1 }
 0x1eb   : > { %693 = vst.msk [vmem:[%s1329_s15 + $0x50] sm:$0xff] %vm489_vm1, %v655_v31  ;;  %v670_v33 = vadd.f32 %v930_v32, %v812_v7 }
 0x1ec   : > { %v664_v34 = vpop.f32.mrf.mxu1 }
 0x1ed   : > { %696 = vst.msk [vmem:[%s1329_s15 + $0x68] sm:$0xff] %vm489_vm1, %v670_v33  ;;  %v665_v35 = vadd.f32 %v812_v7, %v664_v34 }
 0x1ee   : > { %v933_v36 = vpop.f32.mrf.mxu1 }
 0x1ef   : > { %695 = vst.msk [vmem:[%s1329_s15 + $0x60] sm:$0xff] %vm489_vm1, %v665_v35  ;;  %v680_v37 = vadd.f32 %v933_v36, %v812_v7 }
 0x1f0   : > { %v674_v38 = vpop.f32.mrf.mxu1 }
 0x1f1   : > { %698 = vst.msk [vmem:[%s1329_s15 + $0x78] sm:$0xff] %vm489_vm1, %v680_v37  ;;  %v675_v39 = vadd.f32 %v812_v7, %v674_v38 }
 0x1f3   : > { %697 = vst.msk [vmem:[%s1329_s15 + $0x70] sm:$0xff] %vm489_vm1, %v675_v39 }
 0x1f4   : > { %1057 = shalt.err (!%p1054_p10)
}
 0x1f5   : > { %s1058_s17 = scalar_lea.hbm %s1364_s7, 2048  ;;  %s1062_s28 = scalar_lea.hbm %s1418_s5, 4096 }
 0x1f6   : > { %p1059_p0 = scmp.ne.s32.totalorder %s1364_s7, %s1058_s17  ;;  %p1063_p1 = scmp.lt.s32.totalorder %s1364_s7, %s1418_s5 }
 0x1f7   : > { %p1064_p3 = scmp.lt.s32.totalorder %s1062_s28, %s1058_s17 }
 0x1f8   : > { %p1060_p2 = pnand %p1059_p0, %p1427_p12 }
 0x1f9   : > { %p1065_p6 = por %p1064_p3, %p1063_p1 }
 0x1fa   : > { %p1061_p9 = pneg %p1060_p2 }
 0x1fc   : > { %p1066_p11 = pnand %p1065_p6, %p1061_p9 }
 0x1fe   : > { %1069 = shalt.err (!%p1066_p11)
}
 0x1ff   : > { %s1114_s25 = smov 128   ;;  %s1115_s8 = smov 8  }
 0x200   : > { %936 = dma.vmem_to_hbm [thread:$0]  (%p1427_p12), %s1366_s16, 2048, %s1364_s7, %s700_s22, %s1114_s25, %s1114_s25, %s1115_s8  }
 0x201 PF: > { %s728_s29 = sand.u32 1, %s1096_s18   ;;  %p1428_p13 = scmp.ne.s32.totalorder %s1424_s6, 0 }
 0x202   : > { %p1429_p4 = scmp.ge.s32.totalorder %s1108_s21, 2  ;;  %s729_s9 = scalar_lea.sflag [#allocation4], %s728_s29 }
 0x204   : > { %p943_p5 = pnand %p1429_p4, %p1428_p13 }
 0x206   : > { %p944_p7 = pneg %p943_p5 }
 0x208   : > { %1091 = dma.done.wait (%p944_p7), %s729_s9, 2048  }
 0x209   : > { %1093 = vsyncadd (%p944_p7), %s729_s9, 4294965248  ;;  %p18_p8 = scmp.ge.s32.totalorder %s1171_s24, 4   ;;  %s1430_s18 = smov %s1100_s19 }
 0x20a   : > { %s1431_s19 = smov %s1104_s20  ;;  %s1432_s20 = smov %s1183_s27 }
 0x20b   : > { %s1433_s21 = smov %s1171_s24  ;;  %20 = sbr.rel (!%p18_p8) target bundleno = 5 (0x5), region = 85 }
 0x210   :  { %734 = vsyncpa [#allocation3], 1 }
 0x211   :  { %736 = vsyncpa [#allocation3 + $0x1], 1 }
 0x212   :  { %737 = vsyncpa [#allocation4], 1 }
 0x213   :  { %739 = vsyncpa [#allocation4 + $0x1], 1 }

</bundles_post_ra>
